<compile_context>
chip_gen: v7x
topology: tpu7x:2x2x1
jax: 0.10.0
libtpu: 0.0.40
codegen_flags: <defaults>
</compile_context>

<pallas_src>
import jax
import jax.numpy as jnp
import numpy as np
from jax import lax
from jax.experimental import pallas as pl
from jax.experimental.pallas import tpu as pltpu

_INV_TWO_PI = 0.15915494309189535  # 1 / (2*pi)
_LANES = 128


def cont_sparsemax_kernel(mom_ref, basis_ref, r_ref):
    # basis_ref: [3, R, 128] VMEM tile, mom_ref: [B, 8] SMEM, r_ref: [B, R, 128] VMEM.
    cx = basis_ref[0]                      # [R, 128]
    cy = basis_ref[1]
    var = basis_ref[2]

    n_batch = r_ref.shape[0]
    for b in range(n_batch):               # static unroll; B is small
        # Per-batch Sigma / Mu moments come precomputed as cheap SMEM scalars.
        s00 = mom_ref[b, 0]
        s01 = mom_ref[b, 1]
        s11 = mom_ref[b, 2]
        mu0 = mom_ref[b, 3]
        mu1 = mom_ref[b, 4]

        # P = Sigma + var_j * I   (per basis function j)
        p00 = s00 + var                    # [R, 128]
        p11 = s11 + var
        det_p = p00 * p11 - s01 * s01

        dx = mu0 - cx
        dy = mu1 - cy

        # No f32 divides: one EUP rsqrt gives both 1/sqrt(det) and 1/det.
        inv_sqrt_det = lax.rsqrt(det_p)
        inv_det = inv_sqrt_det * inv_sqrt_det

        # diff^T P^{-1} diff via analytic 2x2 inverse.
        quad = (p11 * dx * dx - 2.0 * s01 * dx * dy + p00 * dy * dy) * inv_det

        # integrate_psi: N(Mu; c_j, Sigma + var_j I)
        r = jnp.exp(-0.5 * quad) * (_INV_TWO_PI * inv_sqrt_det)
        r_ref[b] = r.astype(r_ref.dtype)


def _sigma_mu_moments(theta):
    """Per-batch symmetric Sigma and Mu = Sigma @ theta[:, :2]  ->  [B, 8] float32."""
    t = theta.astype(jnp.float32)
    a = -2.0 * t[:, 2]
    b = -2.0 * t[:, 3]
    c = -2.0 * t[:, 4]
    d = -2.0 * t[:, 5]
    inv_det = 1.0 / (a * d - b * c)
    s00 = d * inv_det
    s11 = a * inv_det
    s01 = 0.5 * (-b - c) * inv_det          # symmetrized off-diagonal of Sigma
    mu0 = s00 * t[:, 0] + s01 * t[:, 1]
    mu1 = s01 * t[:, 0] + s11 * t[:, 1]
    z = jnp.zeros_like(s00)
    return jnp.stack([s00, s01, s11, mu0, mu1, z, z, z], axis=-1)       # [B, 8]


def continuous_sparsemax(theta, basis_params, *, block_rows=8):
    """theta: [B, 6]; basis_params: [3, N] rows = (center_x, center_y, var). -> r: [B, N]."""
    B = theta.shape[0]
    N = basis_params.shape[1]
    chunk = block_rows * _LANES

    moments = _sigma_mu_moments(theta)                                  # [B, 8] f32

    # Ragged N: pad with benign basis functions (center 0, variance 1), slice after.
    num_tiles = pl.cdiv(N, chunk)
    n_pad = num_tiles * chunk
    if n_pad != N:
        pad = n_pad - N
        pad_block = jnp.concatenate(
            [jnp.zeros((2, pad), basis_params.dtype),
             jnp.ones((1, pad), basis_params.dtype)], axis=0)
        basis_params = jnp.concatenate([basis_params, pad_block], axis=1)
    nr = n_pad // _LANES
    basis_slab = basis_params.astype(jnp.float32).reshape(3, nr, _LANES)

    cost = pl.CostEstimate(
        flops=int(25 * B * n_pad),
        transcendentals=int(2 * B * n_pad),
        bytes_accessed=int(4 * (3 * n_pad + B * n_pad + B * 8)),
    )

    r_slab = pl.pallas_call(
        cont_sparsemax_kernel,
        out_shape=jax.ShapeDtypeStruct((B, nr, _LANES), theta.dtype),
        grid_spec=pltpu.PrefetchScalarGridSpec(
            num_scalar_prefetch=0,
            grid=(num_tiles,),
            in_specs=[
                # Tiny per-batch moments live in SMEM, resident across the grid.
                pl.BlockSpec(memory_space=pltpu.MemorySpace.SMEM),
                # Lane+sublane-dense basis tile: block_rows x 128 per component.
                pl.BlockSpec((3, block_rows, _LANES), lambda t: (0, t, 0)),
            ],
            out_specs=pl.BlockSpec((B, block_rows, _LANES), lambda t: (0, t, 0)),
        ),
        compiler_params=pltpu.CompilerParams(
            dimension_semantics=("parallel",)),
        cost_estimate=cost,
    )(moments, basis_slab)

    return r_slab.reshape(B, n_pad)[:, :N]


def ref_forward(theta, centers, var):
    """Pure-JAX reference mirroring the PyTorch forward."""
    B = theta.shape[0]
    sig_raw = -2.0 * theta[:, 2:6].reshape(B, 2, 2)
    sig_inv = jnp.linalg.inv(sig_raw)
    Sigma = 0.5 * (sig_inv + jnp.swapaxes(sig_inv, -1, -2))             # [B,2,2]
    Mu = jnp.einsum("bij,bj->bi", Sigma, theta[:, 0:2])                 # [B,2]
    P = Sigma[:, None] + var[None, :, None, None] * jnp.eye(2)          # [B,N,2,2]
    diff = Mu[:, None, :] - centers[None, :, :]                         # [B,N,2]
    Pinv = jnp.linalg.inv(P)
    quad = jnp.einsum("bni,bnij,bnj->bn", diff, Pinv, diff)
    detP = jnp.linalg.det(P)
    return jnp.exp(-0.5 * quad) / (2.0 * jnp.pi * jnp.sqrt(detP))


if __name__ == "__main__":
    B = 2
    key = jax.random.PRNGKey(0)
    k1, k2 = jax.random.split(key)

    # Build a valid theta: theta = (Sigma^{-1} mu, -0.5 * vec(Sigma^{-1})) for SPD Sigma.
    mu_true = jax.random.uniform(k1, (B, 2), dtype=jnp.float32)
    L = 0.1 * jax.random.uniform(k2, (B, 2, 2), dtype=jnp.float32)
    Sigma_true = jnp.einsum("bij,bkj->bik", L, L) + 0.05 * jnp.eye(2, dtype=jnp.float32)
    Sigma_inv = jnp.linalg.inv(Sigma_true)
    theta_lin = jnp.einsum("bij,bj->bi", Sigma_inv, mu_true)            # [B,2]
    theta_quad = (-0.5 * Sigma_inv).reshape(B, 4)                       # [B,4]
    theta = jnp.concatenate([theta_lin, theta_quad], axis=-1).astype(jnp.float32)

    # Deterministic basis: 32x48 = 1536 Gaussian RBF centers on [0,1]^2
    # (deliberately not a multiple of the 1024-wide tile to exercise ragged-N handling).
    gx = jnp.linspace(0.0, 1.0, 32, dtype=jnp.float32)
    gy = jnp.linspace(0.0, 1.0, 48, dtype=jnp.float32)
    cxg, cyg = jnp.meshgrid(gx, gy, indexing="ij")
    centers = jnp.stack([cxg.reshape(-1), cyg.reshape(-1)], axis=-1)    # [N, 2]
    N = centers.shape[0]
    var = jnp.full((N,), 0.01, dtype=jnp.float32)                       # [N]
    basis_params = jnp.concatenate(
        [centers.T, var[None, :]], axis=0).astype(jnp.float32)          # [3, N]

    r = continuous_sparsemax(theta, basis_params)
    r = jax.block_until_ready(r)

    r_ref = ref_forward(theta, centers, var)
    np.testing.assert_allclose(np.asarray(r), np.asarray(r_ref), rtol=1e-4, atol=1e-5)

    print("KERNEL_OK")
</pallas_src>

<mosaic_0001>
module attributes {stable_mosaic.version = 11 : i64} {
  func.func @cont_sparsemax_kernel(%arg0: i32, %arg1: memref<2x8xf32, #tpu.memory_space<smem>>, %arg2: memref<3x8x128xf32, #tpu.memory_space<vmem>>, %arg3: memref<2x8x128xf32, #tpu.memory_space<vmem>>) attributes {dimension_semantics = [#tpu.dimension_semantics<parallel>], iteration_bounds = array<i64: 2>, scalar_prefetch = 0 : i64, scratch_operands = 0 : i64, tpu.core_type = #tpu.core_type<tc>, window_params = [{transform_indices = @transform_0, window_bounds = array<i64: 2, 8>}, {transform_indices = @transform_1, window_bounds = array<i64: 3, 8, 128>}, {transform_indices = @transform_2, window_bounds = array<i64: 2, 8, 128>}]} {
    %c0 = arith.constant 0 : index
    %c0_0 = arith.constant 0 : index
    %c0_1 = arith.constant 0 : index
    %0 = vector.load %arg2[%c0, %c0_0, %c0_1] : memref<3x8x128xf32, #tpu.memory_space<vmem>>, vector<1x8x128xf32>
    %1 = vector.shape_cast %0 : vector<1x8x128xf32> to vector<8x128xf32>
    %c1 = arith.constant 1 : index
    %c0_2 = arith.constant 0 : index
    %c0_3 = arith.constant 0 : index
    %2 = vector.load %arg2[%c1, %c0_2, %c0_3] : memref<3x8x128xf32, #tpu.memory_space<vmem>>, vector<1x8x128xf32>
    %3 = vector.shape_cast %2 : vector<1x8x128xf32> to vector<8x128xf32>
    %c2 = arith.constant 2 : index
    %c0_4 = arith.constant 0 : index
    %c0_5 = arith.constant 0 : index
    %4 = vector.load %arg2[%c2, %c0_4, %c0_5] : memref<3x8x128xf32, #tpu.memory_space<vmem>>, vector<1x8x128xf32>
    %5 = vector.shape_cast %4 : vector<1x8x128xf32> to vector<8x128xf32>
    %c0_6 = arith.constant 0 : index
    %c0_7 = arith.constant 0 : index
    %6 = memref.load %arg1[%c0_6, %c0_7] : memref<2x8xf32, #tpu.memory_space<smem>>
    %c0_8 = arith.constant 0 : index
    %c1_9 = arith.constant 1 : index
    %7 = memref.load %arg1[%c0_8, %c1_9] : memref<2x8xf32, #tpu.memory_space<smem>>
    %c0_10 = arith.constant 0 : index
    %c2_11 = arith.constant 2 : index
    %8 = memref.load %arg1[%c0_10, %c2_11] : memref<2x8xf32, #tpu.memory_space<smem>>
    %c0_12 = arith.constant 0 : index
    %c3 = arith.constant 3 : index
    %9 = memref.load %arg1[%c0_12, %c3] : memref<2x8xf32, #tpu.memory_space<smem>>
    %c0_13 = arith.constant 0 : index
    %c4 = arith.constant 4 : index
    %10 = memref.load %arg1[%c0_13, %c4] : memref<2x8xf32, #tpu.memory_space<smem>>
    %11 = vector.broadcast %6 : f32 to vector<8x128xf32>
    %12 = arith.addf %11, %5 : vector<8x128xf32>
    %13 = vector.broadcast %8 : f32 to vector<8x128xf32>
    %14 = arith.addf %13, %5 : vector<8x128xf32>
    %15 = arith.mulf %12, %14 : vector<8x128xf32>
    %16 = arith.mulf %7, %7 : f32
    %17 = vector.broadcast %16 : f32 to vector<8x128xf32>
    %18 = arith.subf %15, %17 : vector<8x128xf32>
    %19 = vector.broadcast %9 : f32 to vector<8x128xf32>
    %20 = arith.subf %19, %1 : vector<8x128xf32>
    %21 = vector.broadcast %10 : f32 to vector<8x128xf32>
    %22 = arith.subf %21, %3 : vector<8x128xf32>
    %23 = math.rsqrt %18 : vector<8x128xf32>
    %24 = arith.mulf %23, %23 : vector<8x128xf32>
    %25 = arith.mulf %14, %20 : vector<8x128xf32>
    %26 = arith.mulf %25, %20 : vector<8x128xf32>
    %cst = arith.constant 2.000000e+00 : f32
    %27 = arith.mulf %cst, %7 : f32
    %28 = vector.broadcast %27 : f32 to vector<8x128xf32>
    %29 = arith.mulf %28, %20 : vector<8x128xf32>
    %30 = arith.mulf %29, %22 : vector<8x128xf32>
    %31 = arith.subf %26, %30 : vector<8x128xf32>
    %32 = arith.mulf %12, %22 : vector<8x128xf32>
    %33 = arith.mulf %32, %22 : vector<8x128xf32>
    %34 = arith.addf %31, %33 : vector<8x128xf32>
    %35 = arith.mulf %34, %24 : vector<8x128xf32>
    %cst_14 = arith.constant -5.000000e-01 : f32
    %36 = vector.broadcast %cst_14 : f32 to vector<8x128xf32>
    %37 = arith.mulf %36, %35 : vector<8x128xf32>
    %38 = math.exp %37 : vector<8x128xf32>
    %cst_15 = arith.constant 0.159154937 : f32
    %39 = vector.broadcast %cst_15 : f32 to vector<8x128xf32>
    %40 = arith.mulf %39, %23 : vector<8x128xf32>
    %41 = arith.mulf %38, %40 : vector<8x128xf32>
    %c0_16 = arith.constant 0 : index
    %c0_17 = arith.constant 0 : index
    %c0_18 = arith.constant 0 : index
    %42 = vector.load %arg3[%c0_16, %c0_17, %c0_18] : memref<2x8x128xf32, #tpu.memory_space<vmem>>, vector<1x8x128xf32>
    %43 = vector.shape_cast %42 : vector<1x8x128xf32> to vector<8x128xf32>
    %44 = vector.shape_cast %41 : vector<8x128xf32> to vector<1x8x128xf32>
    tpu.vector_store %arg3[%c0_16, %c0_17, %c0_18], %44 {strides = array<i32>} : memref<2x8x128xf32, #tpu.memory_space<vmem>>, vector<1x8x128xf32>,
    %c1_19 = arith.constant 1 : index
    %c0_20 = arith.constant 0 : index
    %45 = memref.load %arg1[%c1_19, %c0_20] : memref<2x8xf32, #tpu.memory_space<smem>>
    %c1_21 = arith.constant 1 : index
    %c1_22 = arith.constant 1 : index
    %46 = memref.load %arg1[%c1_21, %c1_22] : memref<2x8xf32, #tpu.memory_space<smem>>
    %c1_23 = arith.constant 1 : index
    %c2_24 = arith.constant 2 : index
    %47 = memref.load %arg1[%c1_23, %c2_24] : memref<2x8xf32, #tpu.memory_space<smem>>
    %c1_25 = arith.constant 1 : index
    %c3_26 = arith.constant 3 : index
    %48 = memref.load %arg1[%c1_25, %c3_26] : memref<2x8xf32, #tpu.memory_space<smem>>
    %c1_27 = arith.constant 1 : index
    %c4_28 = arith.constant 4 : index
    %49 = memref.load %arg1[%c1_27, %c4_28] : memref<2x8xf32, #tpu.memory_space<smem>>
    %50 = vector.broadcast %45 : f32 to vector<8x128xf32>
    %51 = arith.addf %50, %5 : vector<8x128xf32>
    %52 = vector.broadcast %47 : f32 to vector<8x128xf32>
    %53 = arith.addf %52, %5 : vector<8x128xf32>
    %54 = arith.mulf %51, %53 : vector<8x128xf32>
    %55 = arith.mulf %46, %46 : f32
    %56 = vector.broadcast %55 : f32 to vector<8x128xf32>
    %57 = arith.subf %54, %56 : vector<8x128xf32>
    %58 = vector.broadcast %48 : f32 to vector<8x128xf32>
    %59 = arith.subf %58, %1 : vector<8x128xf32>
    %60 = vector.broadcast %49 : f32 to vector<8x128xf32>
    %61 = arith.subf %60, %3 : vector<8x128xf32>
    %62 = math.rsqrt %57 : vector<8x128xf32>
    %63 = arith.mulf %62, %62 : vector<8x128xf32>
    %64 = arith.mulf %53, %59 : vector<8x128xf32>
    %65 = arith.mulf %64, %59 : vector<8x128xf32>
    %cst_29 = arith.constant 2.000000e+00 : f32
    %66 = arith.mulf %cst_29, %46 : f32
    %67 = vector.broadcast %66 : f32 to vector<8x128xf32>
    %68 = arith.mulf %67, %59 : vector<8x128xf32>
    %69 = arith.mulf %68, %61 : vector<8x128xf32>
    %70 = arith.subf %65, %69 : vector<8x128xf32>
    %71 = arith.mulf %51, %61 : vector<8x128xf32>
    %72 = arith.mulf %71, %61 : vector<8x128xf32>
    %73 = arith.addf %70, %72 : vector<8x128xf32>
    %74 = arith.mulf %73, %63 : vector<8x128xf32>
    %cst_30 = arith.constant -5.000000e-01 : f32
    %75 = vector.broadcast %cst_30 : f32 to vector<8x128xf32>
    %76 = arith.mulf %75, %74 : vector<8x128xf32>
    %77 = math.exp %76 : vector<8x128xf32>
    %cst_31 = arith.constant 0.159154937 : f32
    %78 = vector.broadcast %cst_31 : f32 to vector<8x128xf32>
    %79 = arith.mulf %78, %62 : vector<8x128xf32>
    %80 = arith.mulf %77, %79 : vector<8x128xf32>
    %c1_32 = arith.constant 1 : index
    %c0_33 = arith.constant 0 : index
    %c0_34 = arith.constant 0 : index
    %81 = vector.load %arg3[%c1_32, %c0_33, %c0_34] : memref<2x8x128xf32, #tpu.memory_space<vmem>>, vector<1x8x128xf32>
    %82 = vector.shape_cast %81 : vector<1x8x128xf32> to vector<8x128xf32>
    %83 = vector.shape_cast %80 : vector<8x128xf32> to vector<1x8x128xf32>
    tpu.vector_store %arg3[%c1_32, %c0_33, %c0_34], %83 {strides = array<i32>} : memref<2x8x128xf32, #tpu.memory_space<vmem>>, vector<1x8x128xf32>,
    return
  }
  func.func @transform_0(%arg0: i32) -> (i32, i32) {
    %c0_i32 = arith.constant 0 : i32
    %c0_i32_0 = arith.constant 0 : i32
    %c0_i32_1 = arith.constant 0 : i32
    return %c0_i32, %c0_i32_0 : i32, i32
  }
  func.func @transform_1(%arg0: i32) -> (i32, i32, i32) {
    %c0_i32 = arith.constant 0 : i32
    %c0_i32_0 = arith.constant 0 : i32
    %c0_i32_1 = arith.constant 0 : i32
    return %c0_i32, %arg0, %c0_i32_0 : i32, i32, i32
  }
  func.func @transform_2(%arg0: i32) -> (i32, i32, i32) {
    %c0_i32 = arith.constant 0 : i32
    %c0_i32_0 = arith.constant 0 : i32
    %c0_i32_1 = arith.constant 0 : i32
    return %c0_i32, %arg0, %c0_i32_0 : i32, i32, i32
  }
}

</mosaic_0001>

<bundles_post_ra>
// kernel: tpu_custom_call.1
= control target key start
LH: loop header
LB: loop body
LE: loop exit
PB: predicated region body
PF: predicated region fallthrough
CT: control target
= control target key end

     0   :  { %7 = vsyncpa [#allocation5], 0  ;;  %s784_s0 = inlined_call_operand.hbm [shape: f32[2,8], index: 0, kind: input, shape index: {}]   ;;  %s785_s1 = inlined_call_operand.hbm [shape: f32[3,16,128], index: 1, kind: input, shape index: {}]   ;;  %s786_s2 = inlined_call_operand.hbm [shape: f32[2,16,128], index: 2, kind: output, shape index: {}]  }
   0x1   :  { %8 = vsyncpa [#allocation3], 0 }
   0x2   :  { %10 = vsyncpa [#allocation3 + $0x1], 0 }
   0x3   :  { %11 = vsyncpa [#allocation4], 0 }
   0x4   :  { %13 = vsyncpa [#allocation4 + $0x1], 0  ;;  %s585_s9 = smov 0   ;;  %s587_s10 = smov 0  }
   0x5   :  { %s589_s11 = smov 0   ;;  %s591_s12 = smov 0  }
   0x6 LB: > { %s606_s13 = sadd.s32 4294967295, %s559_s12   ;;  %s349_s14 = sadd.s32 4294967294, %s559_s12   ;;  %s559_s12 = sphi %s591_s12, %s806_s12   ;;  %s555_s11 = sphi %s589_s11, %s805_s11   ;;  %s551_s10 = sphi %s587_s10, %s804_s10   ;;  %s547_s9 = sphi %s585_s9, %s803_s9  }
   0x7   : > { %s610_s15 = sadd.s32 1, %s559_s12   ;;  %s47_s16 = sadd.s32 1, %s555_s11 }
   0x8   : > { %s44_s17 = ssub.s32 %s559_s12, %s610_s15  ;;  %p54_p0 = scmp.ne.s32.totalorder %s555_s11, %s551_s10 }
   0x9   : > { %p45_p1 = scmp.eq.s32.totalorder %s44_s17, 0  ;;  %p55_p2 = scmp.eq.s32.totalorder %s559_s12, 0 }
   0xa   : > { %p60_p3 = scmp.ne.s32.totalorder %s551_s10, %s547_s9  ;;  %p787_p4 = scmp.eq.s32.totalorder %s606_s13, 0 }
   0xb   : > { %s622_s18 = scalar_select %p45_p1, %s555_s11, %s47_s16  }
   0xc   : > { %p624_p5 = por %p55_p2, %p54_p0  ;;  %p630_p6 = por %p787_p4, %p60_p3 }
   0xd   : > { %p84_p7 = scmp.eq.s32.totalorder %s606_s13, 1  ;;  %p90_p8 = scmp.eq.s32.totalorder %s349_s14, 1 }
   0xe   : > { %s791_s20 = scalar_select %p630_p6, 1, 0 }
   0xf   : > { %p350_p9 = scmp.ge.s32.totalorder %s559_s12, 1  ;;  %p97_p10 = scmp.lt.s32.totalorder %s559_s12, 3 }
  0x10   : > { %p637_p11 = por %p84_p7, %p54_p0  ;;  %p641_p12 = por %p90_p8, %p60_p3 }
  0x11   : > { %p645_p13 = pnand %p350_p9, %p97_p10  ;;  %p396_p4 = scmp.lt.s32.totalorder %s559_s12, 2 }
  0x12   : > { %s792_s21 = scalar_select %p637_p11, 1, 0 }
  0x13   : > { %s793_s22 = scalar_select %p641_p12, 1, 0 }
  0x14   : > { %p383_p2 = pneg %p645_p13  ;;  %s119_s24 = sand.u32 1, %s555_s11  }
  0x15   : > { %s353_s25 = sshll.u32 %s559_s12, 7  ;;  %p795_p6 = scmp.eq.s32.totalorder %s606_s13, 0 }
  0x16   : > { %p659_p7 = pnand %p396_p4, %p624_p5  ;;  %s373_s27 = smul.u32 24, %s119_s24 }
  0x17   : > { %p384_p0 = pnand %p383_p2, %p795_p6  ;;  %s446_s30 = scalar_lea.hbm %s784_s0, 32 }
  0x18   : > { %p447_p3 = scmp.ne.s32.totalorder %s784_s0, %s446_s30  ;;  %p453_p6 = scmp.lt.u32.totalorder %s446_s30, %s784_s0 }
  0x19   : > { %p448_p8 = pneg %p384_p0 }
  0x1b   : > { %p449_p9 = pnand %p448_p8, %p447_p3 }
  0x1d   : > { %p450_p10 = pneg %p449_p9 }
  0x1f   : > { %p455_p4 = pnand %p453_p6, %p450_p10 }
  0x21   : > { %458 = shalt.err (!%p455_p4)
}
  0x22   : > { %s561_s7 = smov [#allocation2]   ;;  %s678_s19 = scalar_lea.hbm %s785_s1, %s353_s25 }
  0x23   : > { %386 = dma.hbm_to_smem (!%p384_p0), %s784_s0, 32, %s561_s7, [#allocation5]  }
  0x24   : > { %s123_s28 = scalar_lea.vmem [#allocation6], %s373_s27  ;;  %s682_s30 = scalar_lea.sflag [#allocation3], %s119_s24 }
  0x25   : > { %s129_s29 = sshll.u32 %s123_s28, 4  ;;  %s459_s3 = scalar_lea.hbm %s678_s19, 384  ;;  %s680_s29 = int_to_ptr.vmem [resolvable:$true] %s129_s29 }
  0x26   : > { %p460_p5 = scmp.ne.s32.totalorder %s678_s19, %s459_s3  ;;  %p461_p2 = pneg %p659_p7 }
  0x27   : > { %s464_s5 = scalar_lea.hbm %s785_s1, 768  ;;  %p465_p8 = scmp.lt.u32.totalorder %s678_s19, %s785_s1 }
  0x28   : > { %p462_p0 = pnand %p461_p2, %p460_p5  ;;  %p466_p9 = scmp.lt.u32.totalorder %s464_s5, %s459_s3 }
  0x29   : > { %p468_p6 = scmp.lt.u32.totalorder %s459_s3, %s678_s19 }
  0x2a   : > { %p463_p3 = pneg %p462_p0  ;;  %p467_p10 = por %p466_p9, %p465_p8 }
  0x2c   : > { %p469_p4 = por %p468_p6, %p467_p10 }
  0x2e   : > { %p470_p1 = pnand %p469_p4, %p463_p3 }
  0x30   : > { %473 = shalt.err (!%p470_p1)
}
  0x31   : > { %s474_s24 = scalar_lea.vmem %s680_s29, 384  ;;  %s562_s27 = smov [#allocation6]  }
  0x32   : > { %p475_p5 = scmp.ne.s32.totalorder %s680_s29, %s474_s24  ;;  %s479_s8 = sshll.u32 %s562_s27, 4  ;;  %s480_s8 = int_to_ptr.vmem [resolvable:$false] %s479_s8 }
  0x33   : > { %s481_s14 = scalar_lea.vmem %s480_s8, 768  ;;  %p482_p11 = scmp.lt.s32.totalorder %s680_s29, %s480_s8 }
  0x34   : > { %p477_p0 = pnand %p475_p5, %p461_p2  ;;  %p483_p8 = scmp.lt.s32.totalorder %s481_s14, %s474_s24 }
  0x36   : > { %p478_p12 = pneg %p477_p0  ;;  %p484_p9 = por %p483_p8, %p482_p11 }
  0x38   : > { %p485_p10 = pnand %p484_p9, %p478_p12 }
  0x3a   : > { %488 = shalt.err (!%p485_p10)
}
  0x3b   : > { %s563_s16 = smov 256   ;;  %s564_s17 = smov 128  }
  0x3c   : > { %s565_s28 = smov 8   ;;  %141 = sbr.rel (%p645_p13) target bundleno = 140 (0x8c), region = 28 }
  0x3d   : > { %390 = dma.hbm_to_vmem [thread:$0]  (!%p659_p7), %s678_s19, 384, %s680_s29, %s682_s30, %s563_s16, %s564_s17, %s565_s28  }
  0x3e   : > { %p797_p1 = scmp.eq.s32.totalorder (!%p645_p13), %s606_s13, 0 }
  0x43   : > { %534 = dma.done.wait (%p797_p1), [#allocation5], 32   ;;  %p798_p2 = pmov %p797_p1 }
  0x44   : > { %s717_s3 = sand.u32 1, %s551_s10   ;;  %p799_p11 = scmp.ne.s32.totalorder %s791_s20, 0 }
  0x45   : > { %536 = vsyncadd (%p798_p2), [#allocation5], 4294967264  ;;  %s374_s25 = smul.u32 24, %s717_s3  ;;  %s148_s4 = scalar_lea.sflag [#allocation3], %s717_s3 }
  0x47   : > { %s151_s5 = scalar_lea.vmem [#allocation6], %s374_s25 }
  0x48   : > { %538 = dma.done.wait (%p799_p11), %s148_s4, 384  }
  0x49   : > { %540 = vsyncadd (%p799_p11), %s148_s4, 4294966912 }
  0x4a   : > { %156 = sfence }
  0x4b   : > { %s178_s23 = sld [smem:[#allocation2]]  ;;  %s359_s26 = sld [smem:[#allocation2 + $0x1]]  ;;  %v358_v0 = vld [vmem:[%s151_s5 + $0x10] sm:$0xff]  ;;  %v173_v1 = vld [vmem:[%s151_s5] sm:$0xff]  ;;  %v357_v3 = vld [vmem:[%s151_s5 + $0x8] sm:$0xff] }
  0x4c   : > { %s360_s19 = sld [smem:[#allocation2 + $0x2]]  ;;  %s361_s29 = sld [smem:[#allocation2 + $0x3]] }
  0x4d   : > { %s362_s30 = sld [smem:[#allocation2 + $0x4]]  ;;  %s363_s6 = sld [smem:[#allocation2 + $0x80]] }
  0x4e   : > { %s725_s7 = sld [smem:[#allocation2 + $0x81]]  ;;  %s365_s24 = sld [smem:[#allocation2 + $0x82]] }
  0x4f   : > { %s366_s27 = sld [smem:[#allocation2 + $0x83]]  ;;  %s727_s8 = sld [smem:[#allocation2 + $0x84]] }
  0x50   : > { %s356_s28 = sshll.u32 %s717_s3, 4  ;;  %s370_s5 = sshll.u32 %s606_s13, 7 }
  0x51   : > { %v183_v2 = vstv %s178_s23  ;;  %s188_s20 = smul.f32 %s359_s26, %s359_s26  ;;  %s172_s25 = scalar_lea.vmem [#allocation7], %s356_s28 }
  0x52   : > { %v184_v4 = vadd.f32 %v358_v0, %v183_v2  ;;  %v185_v5 = vstv %s360_s19  ;;  %v191_v6 = vstv %s361_s29  ;;  %s199_s14 = smul.f32 2.0, %s359_s26  ;;  %s264_s4 = sshll.u32 %s172_s25, 4  ;;  %s735_s4 = int_to_ptr.vmem [resolvable:$true] %s264_s4 }
  0x53   : > { %v186_v7 = vadd.f32 %v358_v0, %v185_v5  ;;  %v192_v8 = vsub.f32 %v191_v6, %v173_v1  ;;  %v193_v9 = vstv %s362_s30  ;;  %v189_v10 = vstv %s188_s20  ;;  %s740_s19 = scalar_lea.hbm %s786_s2, %s370_s5  ;;  %s252_s29 = scalar_lea.sflag [#allocation4], %s717_s3 }
  0x54   : > { %v194_v11 = vsub.f32 %v193_v9, %v357_v3  ;;  %v200_v12 = vstv %s199_s14  ;;  %v219_v13 = vstv %s363_s6  ;;  %s224_s16 = smul.f32 %s725_s7, %s725_s7  ;;  %v221_v18 = vstv %s365_s24  ;;  %s489_s30 = scalar_lea.vmem %s735_s4, 256 }
  0x55   : > { %v187_v14 = vmul.f32 %v186_v7, %v184_v4  ;;  %v197_v15 = vmul.f32 %v192_v8, %v186_v7  ;;  %v220_v16 = vadd.f32 %v358_v0, %v219_v13  ;;  %v201_v17 = vmul.f32 %v200_v12, %v192_v8  ;;  %s235_s17 = smul.f32 2.0, %s725_s7  ;;  %p490_p12 = scmp.ne.s32.totalorder %s735_s4, %s489_s30 }
  0x56   : > { %v227_v19 = vstv %s366_s27  ;;  %v222_v21 = vadd.f32 %v358_v0, %v221_v18  ;;  %v229_v22 = vstv %s727_s8  ;;  %v204_v23 = vmul.f32 %v194_v11, %v184_v4  ;;  %p800_p13 = scmp.ne.s32.totalorder %s792_s21, 0  ;;  %s566_s13 = smov [#allocation7]  }
  0x57   : > { %v190_v20 = vsub.f32 %v187_v14, %v189_v10  ;;  %v225_v24 = vstv %s224_s16  ;;  %v228_v25 = vsub.f32 %v227_v19, %v173_v1  ;;  %v198_v26 = vmul.f32 %v197_v15, %v192_v8  ;;  %s493_s6 = sshll.u32 %s566_s13, 4  ;;  %s494_s6 = int_to_ptr.vmem [resolvable:$false] %s493_s6 }
  0x58   : > { %v223_v27 = vmul.f32 %v222_v21, %v220_v16  ;;  %v236_v28 = vstv %s235_s17  ;;  %v202_v29 = vmul.f32 %v201_v17, %v194_v11  ;;  %v230_v30 = vsub.f32 %v229_v22, %v357_v3  ;;  %p491_p7 = pnand %p490_p12, %p800_p13  ;;  %s495_s7 = scalar_lea.vmem %s494_s6, 512 }
  0x59   : > { %438 = vrsqrt.f32 %v190_v20  ;;  %v233_v31 = vmul.f32 %v228_v25, %v222_v21  ;;  %v237_v32 = vmul.f32 %v236_v28, %v228_v25  ;;  %v205_v34 = vmul.f32 %v204_v23, %v194_v11  ;;  %p496_p6 = scmp.lt.s32.totalorder %s735_s4, %s494_s6  ;;  %p497_p4 = scmp.lt.s32.totalorder %s495_s7, %s489_s30 }
  0x5a   : > { %v226_v33 = vsub.f32 %v223_v27, %v225_v24  ;;  %v203_v35 = vsub.f32 %v198_v26, %v202_v29  ;;  %v240_v38 = vmul.f32 %v230_v30, %v220_v16  ;;  %p492_p3 = pneg %p491_p7 }
  0x5b   : > { %v234_v36 = vmul.f32 %v233_v31, %v228_v25  ;;  %v238_v37 = vmul.f32 %v237_v32, %v230_v30  ;;  %p498_p5 = por %p497_p4, %p496_p6 }
  0x5c   : > { %440 = vrsqrt.f32 %v226_v33  ;;  %v206_v39 = vadd.f32 %v205_v34, %v203_v35  ;;  %v241_v41 = vmul.f32 %v240_v38, %v230_v30 }
  0x5d   : > { %v239_v40 = vsub.f32 %v234_v36, %v238_v37  ;;  %p499_p0 = pnand %p498_p5, %p492_p3 }
  0x5f   : > { %v242_v45 = vadd.f32 %v241_v41, %v239_v40 }
  0x63   : > { %v439_v42 = vpop.eup %438 }
  0x64   : > { %v196_v43 = vmul.f32 %v439_v42, %v439_v42  ;;  %v211_v53 = vmul.f32 0.15915494, %v439_v42 }
  0x66   : > { %v207_v44 = vmul.f32 %v206_v39, %v196_v43  ;;  %v441_v46 = vpop.eup %440 }
  0x67   : > { %v232_v48 = vmul.f32 %v441_v46, %v441_v46  ;;  %v247_v56 = vmul.f32 0.15915494, %v441_v46 }
  0x68   : > { %v208_v47 = vmul.f32 -0.5, %v207_v44 }
  0x69   : > { %v243_v50 = vmul.f32 %v242_v45, %v232_v48 }
  0x6a   : > { %v209_v49 = vmul.f32 1.442695, %v208_v47 }
  0x6b   : > { %v244_v51 = vmul.f32 -0.5, %v243_v50 }
  0x6c   : > { %442 = vpow2.f32 %v209_v49 }
  0x6d   : > { %v245_v52 = vmul.f32 1.442695, %v244_v51 }
  0x6f   : > { %444 = vpow2.f32 %v245_v52 }
  0x76   : > { %v443_v54 = vpop.eup %442 }
  0x77   : > { %v212_v55 = vmul.f32 %v443_v54, %v211_v53 }
  0x79   : > { %213 = vst [vmem:[%s172_s25] sm:$0xff] %v212_v55  ;;  %v445_v57 = vpop.eup %444 }
  0x7a   : > { %v248_v58 = vmul.f32 %v445_v57, %v247_v56 }
  0x7c   : > { %368 = vst [vmem:[%s172_s25 + $0x8] sm:$0xff] %v248_v58 }
  0x7d   : > { %502 = shalt.err (!%p499_p0)
}
  0x7e   : > { %s503_s24 = scalar_lea.hbm %s740_s19, 256  ;;  %s507_s20 = scalar_lea.hbm %s786_s2, 512 }
  0x7f   : > { %p504_p8 = scmp.ne.s32.totalorder %s740_s19, %s503_s24  ;;  %p508_p1 = scmp.lt.u32.totalorder %s740_s19, %s786_s2 }
  0x80   : > { %p509_p2 = scmp.lt.u32.totalorder %s507_s20, %s503_s24  ;;  %p511_p12 = scmp.lt.u32.totalorder %s503_s24, %s740_s19 }
  0x81   : > { %p505_p9 = pnand %p504_p8, %p800_p13 }
  0x82   : > { %p510_p11 = por %p509_p2, %p508_p1 }
  0x83   : > { %p506_p10 = pneg %p505_p9 }
  0x84   : > { %p512_p7 = por %p511_p12, %p510_p11 }
  0x86   : > { %p513_p3 = pnand %p512_p7, %p506_p10 }
  0x88   : > { %516 = shalt.err (!%p513_p3)
}
  0x89   : > { %s567_s17 = smov 128   ;;  %s568_s28 = smov 256  }
  0x8a   : > { %s569_s25 = smov 8  }
  0x8b   : > { %381 = dma.vmem_to_hbm [thread:$0]  (%p800_p13), %s735_s4, 256, %s740_s19, %s252_s29, %s567_s17, %s568_s28, %s569_s25  }
  0x8c PF: > { %s279_s5 = sand.u32 1, %s547_s9   ;;  %p801_p6 = scmp.ne.s32.totalorder %s793_s22, 0 }
  0x8d   : > { %p802_p4 = scmp.ge.s32.totalorder %s559_s12, 2  ;;  %s280_s23 = scalar_lea.sflag [#allocation4], %s279_s5 }
  0x8f   : > { %p392_p5 = pnand %p802_p4, %p801_p6 }
  0x91   : > { %542 = dma.done.wait (!%p392_p5), %s280_s23, 256  }
  0x92   : > { %544 = vsyncadd (!%p392_p5), %s280_s23, 4294967040  ;;  %p16_p0 = scmp.ge.s32.totalorder %s610_s15, 4   ;;  %s803_s9 = smov %s551_s10 }
  0x93   : > { %s804_s10 = smov %s555_s11  ;;  %s805_s11 = smov %s622_s18 }
  0x94   : > { %s806_s12 = smov %s610_s15  ;;  %18 = sbr.rel (!%p16_p0) target bundleno = 6 (0x6), region = 81 }
  0x9b   :  { %285 = vsyncpa [#allocation3], 1 }
  0x9c   :  { %287 = vsyncpa [#allocation3 + $0x1], 1 }
  0x9d   :  { %288 = vsyncpa [#allocation4], 1 }
  0x9e   :  { %290 = vsyncpa [#allocation4 + $0x1], 1 }
  0x9f   :  { %291 = vsyncpa [#allocation5], 1 }
  0xa0   :  { %293 = vsyncpa [#allocation5 + $0x1], 1 }

</bundles_post_ra>
